<compile_context>
chip_gen: v6e
topology: v6e:2x2x1
jax: 0.10.0
libtpu: 0.0.40
codegen_flags: <defaults>
</compile_context>

<pallas_src>
import functools

import jax
import jax.numpy as jnp
from jax.experimental import pallas as pl
from jax.experimental.pallas import tpu as pltpu


def _lane_sum_f32(fm_ref, length):
    """f32 sum of lanes [0, length) of the current (tm, ts) tile.

    Casts per 128-lane chunk (no full-tile f32 temp): VPU chunk-adds into a
    (tm, 128) accumulator, then a single XLU lane reduce.
    """
    n_chunks = length // 128
    rem = length - n_chunks * 128

    if n_chunks == 0:
        # Small spatial extent: single narrow load + lane reduce.
        return jnp.sum(fm_ref[:, :length].astype(jnp.float32),
                       axis=-1, keepdims=True)

    if n_chunks <= 8:
        # Few chunks: static unroll (full LLO visibility, zero loop overhead).
        acc = fm_ref[:, 0:128].astype(jnp.float32)
        for c in range(1, n_chunks):
            acc = acc + fm_ref[:, c * 128:(c + 1) * 128].astype(jnp.float32)
    else:
        # Many chunks: rolled loop with modest unroll; per-chunk f32 cast keeps
        # live data to one accumulator + one chunk (a few vregs).
        def body(c, a):
            start = pl.multiple_of(c * 128, 128)
            return a + fm_ref[:, pl.ds(start, 128)].astype(jnp.float32)

        acc = jax.lax.fori_loop(1, n_chunks, body,
                                fm_ref[:, 0:128].astype(jnp.float32),
                                unroll=8)

    s = jnp.sum(acc, axis=-1, keepdims=True)
    if rem:
        s = s + jnp.sum(fm_ref[:, n_chunks * 128:length].astype(jnp.float32),
                        axis=-1, keepdims=True)
    return s


def _roi_avg_kernel(fm_ref, avg_ref, acc_ref, *, hw, ts, n_k):
    # fm_ref : (tm, ts) input tile (original dtype, cast per-chunk in f32).
    # avg_ref: (tm, 1) output block (written only on the last spatial step).
    # acc_ref: (tm, 1) f32 VMEM accumulator across the spatial grid axis.
    k = pl.program_id(1)
    last_valid = hw - (n_k - 1) * ts  # static: valid lanes in last spatial tile

    @pl.when(k == 0)
    def _init():
        acc_ref[...] = jnp.zeros_like(acc_ref)

    if last_valid == ts:
        # Spatial extent divides evenly (or there is a single spatial tile).
        acc_ref[...] += _lane_sum_f32(fm_ref, ts)
    else:
        @pl.when(k < n_k - 1)
        def _full_tile():
            acc_ref[...] += _lane_sum_f32(fm_ref, ts)

        @pl.when(k == n_k - 1)
        def _ragged_tile():
            # Static shorter-length sum: padded OOB lanes are never read.
            acc_ref[...] += _lane_sum_f32(fm_ref, last_valid)

    @pl.when(k == n_k - 1)
    def _finalize():
        avg_ref[...] = (acc_ref[...] * (1.0 / float(hw))).astype(avg_ref.dtype)


def _pick_tiling(rows, hw, itemsize):
    """Byte-budgeted, generation-aware tile selection."""
    # Physical VMEM: v5e/v6e = 128 MiB, v7x = 64 MiB per TensorCore.
    phys_vmem = 64 * 1024 * 1024  # conservative default (v7x)
    try:
        info = pltpu.get_tpu_info()
        phys_vmem = int(getattr(info, "vmem_capacity_bytes", phys_vmem)) or phys_vmem
    except Exception:
        pass
    if phys_vmem >= 100 * 1024 * 1024:           # v5e / v6e
        tile_budget, vmem_limit = 12 * 1024 * 1024, 80 * 1024 * 1024
    else:                                        # v7x
        tile_budget, vmem_limit = 6 * 1024 * 1024, 44 * 1024 * 1024

    row_bytes = hw * itemsize

    # Row-tile height: as many rows as the byte budget allows (no fixed cap).
    if rows * row_bytes <= tile_budget:
        tm = rows
    else:
        tm = min(rows, max(8, (tile_budget // row_bytes // 8) * 8))

    # Prefer >= 4 programs on the parallel row axis when each piece stays
    # >= 2 MiB: lets v7x shard across both TensorCores, ~free on 1-TC chips.
    for want in (4, 2):
        cand = ((pl.cdiv(rows, want) + 7) // 8) * 8
        if cand < rows and cand < tm and cand * row_bytes >= (2 << 20):
            tm = cand
            break

    # Spatial tiling only if even the minimal row tile blows the byte budget.
    if tm * row_bytes > tile_budget and hw > 128:
        ts = max(128, (tile_budget // (tm * itemsize)) // 128 * 128)
        ts = min(ts, hw)
    else:
        ts = hw
    n_k = pl.cdiv(hw, ts)
    return tm, ts, n_k, vmem_limit


def roi_pooling(feature_map, cluster_center, spatial_ratio):
    """Pallas equivalent of ROI_Pooling.forward.

    feature_map   : (N, C, H, W) float array (NCHW, matching PyTorch).
    cluster_center: (K, 2) float array (its arithmetic does not affect output).
    spatial_ratio : scalar.
    Returns a list with one (N, C) array: the global-avg-pooled feature map
    flattened from dim 1 — exactly what the PyTorch module returns.
    """
    N, C, H, W = feature_map.shape
    rows, hw = N * C, H * W
    fm2d = feature_map.reshape(rows, hw)
    itemsize = jnp.dtype(feature_map.dtype).itemsize

    tm, ts, n_k, vmem_limit = _pick_tiling(rows, hw, itemsize)
    grid = (pl.cdiv(rows, tm), n_k)

    # NOTE: output is (rows, 1) -> narrow masked stores, but output volume is
    # only 1/(H*W) of the input, so a lane-dense output layout is not worth it.
    avg = pl.pallas_call(
        functools.partial(_roi_avg_kernel, hw=hw, ts=ts, n_k=n_k),
        out_shape=jax.ShapeDtypeStruct((rows, 1), feature_map.dtype),
        grid=grid,
        in_specs=[pl.BlockSpec((tm, ts), lambda i, k: (i, k))],
        out_specs=pl.BlockSpec((tm, 1), lambda i, k: (i, 0)),
        scratch_shapes=[pltpu.VMEM((tm, 1), jnp.float32)],
        compiler_params=pltpu.CompilerParams(
            dimension_semantics=("parallel", "arbitrary"),
            vmem_limit_bytes=vmem_limit,
        ),
    )(fm2d)

    # --- cluster-center bookkeeping (present in the PyTorch forward, but its
    # result never reaches the returned features). Kept as plain-JAX glue for
    # semantic parity; scalar/tiny elementwise math, not a hot path.
    cc_mean = jnp.mean(cluster_center, axis=0)
    cc_norm = cc_mean / spatial_ratio
    cc_int = jnp.floor(cc_norm)
    cc_float = cc_norm - cc_int
    cc_off = jnp.round(cc_float) * 2.0 - 1.0
    _ = cc_int + 1.0 + cc_off  # unused downstream, matching the reference

    patch_flatten = avg.reshape(N, C)  # torch.flatten(patch_avg, 1)
    return [patch_flatten]


if __name__ == "__main__":
    key = jax.random.PRNGKey(0)
    k1, k2 = jax.random.split(key)

    # Small shapes consistent with the module's forward.
    N, C, H, W = 2, 4, 16, 16
    feature_map = jax.random.normal(k1, (N, C, H, W), dtype=jnp.float32)
    cluster_center = jax.random.uniform(k2, (8, 2), dtype=jnp.float32) * 16.0
    spatial_ratio = 4.0

    out = roi_pooling(feature_map, cluster_center, spatial_ratio)
    jax.block_until_ready(out)

    # Reference check: global average pool, flattened to (N, C).
    ref = jnp.mean(feature_map, axis=(2, 3))
    assert isinstance(out, list) and len(out) == 1
    assert out[0].shape == (N, C)
    assert jnp.allclose(out[0], ref, atol=1e-5), "mismatch vs. reference avg pool"

    print("KERNEL_OK")
</pallas_src>

<mosaic_0001>
module attributes {stable_mosaic.version = 11 : i64} {
  func.func @_roi_avg_kernel(%arg0: i32, %arg1: i32, %arg2: memref<8x256xf32, #tpu.memory_space<vmem>>, %arg3: memref<8x1xf32, #tpu.memory_space<vmem>>, %arg4: memref<8x1xf32, #tpu.memory_space<vmem>>) attributes {dimension_semantics = [#tpu.dimension_semantics<parallel>, #tpu.dimension_semantics<arbitrary>], iteration_bounds = array<i64: 1, 1>, scalar_prefetch = 0 : i64, scratch_operands = 1 : i64, tpu.core_type = #tpu.core_type<tc>, window_params = [{transform_indices = @transform_0, window_bounds = array<i64: 8, 256>}, {transform_indices = @transform_1, window_bounds = array<i64: 8, 1>}]} {
    %c0_i32 = arith.constant 0 : i32
    %0 = arith.cmpi eq, %arg1, %c0_i32 : i32
    %1 = arith.extui %0 : i1 to i32
    %c0_i32_0 = arith.constant 0 : i32
    %2 = arith.cmpi ne, %1, %c0_i32_0 : i32
    scf.if %2 {
      %cst_9 = arith.constant 0.000000e+00 : f32
      %14 = vector.broadcast %cst_9 : f32 to vector<8x1xf32>
      %c0_10 = arith.constant 0 : index
      %c0_11 = arith.constant 0 : index
      %15 = vector.load %arg4[%c0_10, %c0_11] : memref<8x1xf32, #tpu.memory_space<vmem>>, vector<8x1xf32>
      tpu.vector_store %arg4[%c0_10, %c0_11], %14 {strides = array<i32>} : memref<8x1xf32, #tpu.memory_space<vmem>>, vector<8x1xf32>,
    } else {
    }
    %c0 = arith.constant 0 : index
    %c0_1 = arith.constant 0 : index
    %3 = vector.load %arg4[%c0, %c0_1] : memref<8x1xf32, #tpu.memory_space<vmem>>, vector<8x1xf32>
    %c0_2 = arith.constant 0 : index
    %c0_3 = arith.constant 0 : index
    %4 = vector.load %arg2[%c0_2, %c0_3] : memref<8x256xf32, #tpu.memory_space<vmem>>, vector<8x128xf32>
    %c0_4 = arith.constant 0 : index
    %c128 = arith.constant 128 : index
    %5 = vector.load %arg2[%c0_4, %c128] : memref<8x256xf32, #tpu.memory_space<vmem>>, vector<8x128xf32>
    %6 = arith.addf %4, %5 : vector<8x128xf32>
    %cst = arith.constant dense<0.000000e+00> : vector<8xf32>
    %7 = vector.multi_reduction <add>, %6, %cst [1] : vector<8x128xf32> to vector<8xf32>
    %8 = vector.shape_cast %7 : vector<8xf32> to vector<8x1xf32>
    %9 = arith.addf %3, %8 : vector<8x1xf32>
    %c0_5 = arith.constant 0 : index
    %c0_6 = arith.constant 0 : index
    %10 = vector.load %arg4[%c0_5, %c0_6] : memref<8x1xf32, #tpu.memory_space<vmem>>, vector<8x1xf32>
    tpu.vector_store %arg4[%c0_5, %c0_6], %9 {strides = array<i32>} : memref<8x1xf32, #tpu.memory_space<vmem>>, vector<8x1xf32>,
    %c0_i32_7 = arith.constant 0 : i32
    %11 = arith.cmpi eq, %arg1, %c0_i32_7 : i32
    %12 = arith.extui %11 : i1 to i32
    %c0_i32_8 = arith.constant 0 : i32
    %13 = arith.cmpi ne, %12, %c0_i32_8 : i32
    scf.if %13 {
      %c0_9 = arith.constant 0 : index
      %c0_10 = arith.constant 0 : index
      %14 = vector.load %arg4[%c0_9, %c0_10] : memref<8x1xf32, #tpu.memory_space<vmem>>, vector<8x1xf32>
      %cst_11 = arith.constant 3.906250e-03 : f32
      %15 = vector.broadcast %cst_11 : f32 to vector<8x1xf32>
      %16 = arith.mulf %14, %15 : vector<8x1xf32>
      %c0_12 = arith.constant 0 : index
      %c0_13 = arith.constant 0 : index
      %17 = vector.load %arg3[%c0_12, %c0_13] : memref<8x1xf32, #tpu.memory_space<vmem>>, vector<8x1xf32>
      tpu.vector_store %arg3[%c0_12, %c0_13], %16 {strides = array<i32>} : memref<8x1xf32, #tpu.memory_space<vmem>>, vector<8x1xf32>,
    } else {
    }
    return
  }
  func.func @transform_0(%arg0: i32, %arg1: i32) -> (i32, i32) {
    %c0_i32 = arith.constant 0 : i32
    return %arg0, %arg1 : i32, i32
  }
  func.func @transform_1(%arg0: i32, %arg1: i32) -> (i32, i32) {
    %c0_i32 = arith.constant 0 : i32
    %c0_i32_0 = arith.constant 0 : i32
    return %arg0, %c0_i32 : i32, i32
  }
}

</mosaic_0001>

<bundles_post_ra>
// kernel: tpu_custom_call.1
= control target key start
LH: loop header
LB: loop body
LE: loop exit
PB: predicated region body
PF: predicated region fallthrough
CT: control target
= control target key end

     0   :  { %6 = vsyncpa [#allocation4], 0  ;;  %s70_s6 = smov [#allocation3]   ;;  %s88_s0 = inlined_call_operand.hbm [shape: f32[8,256], index: 0, kind: input, shape index: {}]   ;;  %s89_s1 = inlined_call_operand.vmem [shape: f32[8,1], index: 1, kind: output, shape index: {}]  }
   0x1   :  { %s13_s7 = sshll.u32 %s70_s6, 4  ;;  %s14_s7 = int_to_ptr.vmem [resolvable:$true] %s13_s7 }
   0x2   :  { %s56_s8 = scalar_lea.vmem %s14_s7, 256  ;;  %p61_p1 = scmp.lt.s32.totalorder %s14_s7, %s14_s7 }
   0x3   :  { %p57_p0 = scmp.ne.s32.totalorder %s14_s7, %s56_s8  ;;  %p62_p2 = scmp.lt.s32.totalorder %s56_s8, %s56_s8 }
   0x5   :  { %p63_p3 = por %p62_p2, %p61_p1 }
   0x7   :  { %p64_p4 = pnand %p63_p3, %p57_p0 }
   0x9   :  { %67 = shalt.err (!%p64_p4)
}
   0xa   :  { %16 = dma.hbm_to_vmem [thread:$0]  %s88_s0, 256, %s14_s7, [#allocation4]  }
   0xb   :  { %68 = dma.done.wait [#allocation4], 256  }
   0xc   :  { %69 = vsyncadd [#allocation4], 4294967040  ;;  %vm24_vm0 = vcmask 7168   ;;  %v71_v0 = vmov 0.0   ;;  %v27_v1 = vld [vmem:[#allocation3] sm:$0xff]  ;;  %v28_v2 = vld [vmem:[#allocation3 + $0x8] sm:$0xff] }
   0xd   :  { %25 = vst.msk [vmem:[#allocation2] sm:$0xff] %vm24_vm0, %v71_v0  ;;  %v29_v3 = vadd.f32 %v28_v2, %v27_v1 }
   0xf   :  { %30 = vadd.xlane.f32.xlu0 %v29_v3 }
  0x14   :  { %v26_v4 = vld [vmem:[#allocation2] sm:$0xff] }
  0x98   :  { %v31_v5 = vpop.xlane.xlu0 %30 }
  0x99   :  { %v32_v6 = vadd.f32 %v31_v5, %v26_v4 }
  0x9b   :  { %34 = vst.msk [vmem:[#allocation2] sm:$0xff] %vm24_vm0, %v32_v6 }
  0xa2   :  { %v38_v7 = vld [vmem:[#allocation2] sm:$0xff] }
  0xa3   :  { %v39_v8 = vmul.f32 0.00390625, %v38_v7 }
  0xa5   :  { %40 = vst.msk [vmem:[%s89_s1] sm:$0xff] %vm24_vm0, %v39_v8 }
  0xa6   :  { %45 = vsyncpa [#allocation4], 1 }

</bundles_post_ra>
